<compile_context>
chip_gen: v6e
topology: v6e:2x2x1
jax: 0.10.0
libtpu: 0.0.40
codegen_flags: <defaults>
</compile_context>

<pallas_src>
import jax
import jax.numpy as jnp
from jax.experimental import pallas as pl
from jax.experimental.pallas import tpu as pltpu

_BN_EPS = 1e-5
_SIGMA_EPS = 1e-7
_HIDDEN = 128          # hidden width of the two middle layers
_OUT_DIM = 48          # real output width of the last layer
_OUT_PAD = 128         # lane-dense padded output width
_VMEM_BUDGET = 24 * 1024 * 1024   # headroom under the 32 MiB scoped limit


def _encoder_kernel(x_ref,
                    w1_ref, b1_ref,
                    w2_ref, b2_ref,
                    w3_ref, b3_ref,
                    out_ref):
    """One batch tile: three BN-folded Linear+ReLU layers.

    x_ref:   (tile_b, in_channels)           compute dtype
    w1:      (in_channels, 128)               compute dtype
    w2:      (128, 128), w3: (128, 128)       compute dtype (w3 zero-padded)
    b1/b2/b3: (1, 128)                        float32 (added post-accumulate)
    out_ref: (tile_b, 128)                    float32 (lane-dense; cols 48:128 are 0)
    """
    h = jnp.dot(x_ref[...], w1_ref[...],
                preferred_element_type=jnp.float32) + b1_ref[...]
    h = jnp.maximum(h, 0.0).astype(w2_ref.dtype)
    h = jnp.dot(h, w2_ref[...],
                preferred_element_type=jnp.float32) + b2_ref[...]
    h = jnp.maximum(h, 0.0).astype(w3_ref.dtype)
    h = jnp.dot(h, w3_ref[...],
                preferred_element_type=jnp.float32) + b3_ref[...]
    out_ref[...] = jnp.maximum(h, 0.0)


def make_encoder_params(in_channels, key):
    """Linear (PyTorch-like uniform init) + BatchNorm params per layer."""
    dims = [(in_channels, _HIDDEN), (_HIDDEN, _HIDDEN), (_HIDDEN, _OUT_DIM)]
    params = []
    for fin, fout in dims:
        kw, kb, kg, kbt, km, kv, key = jax.random.split(key, 7)
        bound = 1.0 / jnp.sqrt(jnp.float32(fin))
        w = jax.random.uniform(kw, (fin, fout), jnp.float32, -bound, bound)
        b = jax.random.uniform(kb, (fout,), jnp.float32, -bound, bound)
        gamma = 1.0 + 0.1 * jax.random.normal(kg, (fout,), jnp.float32)
        beta = 0.1 * jax.random.normal(kbt, (fout,), jnp.float32)
        rmean = 0.1 * jax.random.normal(km, (fout,), jnp.float32)
        rvar = jnp.abs(1.0 + 0.1 * jax.random.normal(kv, (fout,), jnp.float32))
        params.append((w, b, gamma, beta, rmean, rvar))
    return params


def _fold_bn_and_pad(params, compute_dtype):
    """Fold inference-mode BatchNorm1d into each Linear; pad last layer to 128."""
    folded = []
    n = len(params)
    for li, (w, b, gamma, beta, rmean, rvar) in enumerate(params):
        scale = gamma * jax.lax.rsqrt(rvar + _BN_EPS)
        wf = (w * scale[None, :]).astype(jnp.float32)
        bf = ((b - rmean) * scale + beta).astype(jnp.float32)
        if li == n - 1 and wf.shape[1] < _OUT_PAD:
            pad = _OUT_PAD - wf.shape[1]
            wf = jnp.pad(wf, ((0, 0), (0, pad)))
            bf = jnp.pad(bf, ((0, pad),))
        # Weights in compute dtype (feed the MXU); biases stay f32 (added to
        # the f32 accumulator on the VPU).
        folded.append((wf.astype(compute_dtype), bf.reshape(1, -1)))
    return folded


def _choose_tile_rows(batch, block_rows, cap_rows, sub):
    """Row-tile size: minimize partial-block waste, keep >= 2 grid steps for
    larger batches (v7x megacore), respect the VMEM row cap, multiple of sub."""
    n_tiles = max(1, -(-batch // block_rows))
    if batch > 2 * sub:
        n_tiles = max(n_tiles, 2)
    tile = -(-batch // n_tiles)
    tile = -(-tile // sub) * sub
    tile = min(tile, max(sub, cap_rows))
    return max(tile, sub)


def encoder_forward(x, params, z_dim, block_rows=1024, compute_dtype=jnp.float32):
    """Equivalent of Encoder.forward(x) -> (params, mu, sigma)."""
    B = x.shape[0]
    x2 = x.reshape(B, -1).astype(compute_dtype)
    in_ch = x2.shape[1]

    (w1, b1), (w2, b2), (w3, b3) = _fold_bn_and_pad(params, compute_dtype)

    itemsize = jnp.dtype(compute_dtype).itemsize
    sub = 8 if itemsize >= 4 else 16   # sublane multiple for the row tile

    # VMEM budget: double-buffered x tile + double-buffered f32 output tile,
    # plus the (double-buffered) resident weights.  Kept well under the 32 MiB
    # scoped limit so it also fits v7x's 64 MiB physical VMEM with headroom.
    weight_bytes = 2 * (in_ch + 2 * _HIDDEN) * _HIDDEN * itemsize + 3 * 2 * _HIDDEN * 4
    per_row_bytes = 2 * (in_ch * itemsize + _OUT_PAD * 4)
    cap_rows = max(sub, ((_VMEM_BUDGET - weight_bytes) // per_row_bytes) // sub * sub)

    tile_b = _choose_tile_rows(B, block_rows, cap_rows, sub)
    grid = (pl.cdiv(B, tile_b),)   # partial last block handled by Pallas

    def row_spec(shape):
        return pl.BlockSpec(shape, lambda i: (i, 0))

    def resident(shape):  # same block every grid step -> stays in VMEM
        return pl.BlockSpec(shape, lambda i: (0, 0))

    params_full = pl.pallas_call(
        _encoder_kernel,
        grid=grid,
        in_specs=[
            row_spec((tile_b, in_ch)),
            resident(w1.shape), resident(b1.shape),
            resident(w2.shape), resident(b2.shape),
            resident(w3.shape), resident(b3.shape),
        ],
        out_specs=row_spec((tile_b, _OUT_PAD)),
        out_shape=jax.ShapeDtypeStruct((B, _OUT_PAD), jnp.float32),
        compiler_params=pltpu.CompilerParams(
            dimension_semantics=("parallel",),
            vmem_limit_bytes=32 * 1024 * 1024,
        ),
    )(x2, w1, b1, w2, b2, w3, b3)

    params_out = params_full[:, :_OUT_DIM]
    mu = params_out[:, :z_dim]
    # softplus on the tiny sliced sigma columns fuses in the wrapper; doing it
    # in-kernel forced a lane-offset slice and a masked 24-wide store.
    sigma = jax.nn.softplus(params_out[:, z_dim:]) + _SIGMA_EPS
    return params_out, mu, sigma


def _reference_forward(x, params, z_dim):
    """Pure-JAX reference (unfused Linear + inference BN + ReLU)."""
    B = x.shape[0]
    h = x.reshape(B, -1).astype(jnp.float32)
    for (w, b, gamma, beta, rmean, rvar) in params:
        h = h @ w + b
        h = (h - rmean) / jnp.sqrt(rvar + _BN_EPS) * gamma + beta
        h = jnp.maximum(h, 0.0)
    mu = h[:, :z_dim]
    sigma = jax.nn.softplus(h[:, z_dim:]) + _SIGMA_EPS
    return h, mu, sigma


if __name__ == "__main__":
    key = jax.random.PRNGKey(0)
    kx, kp = jax.random.split(key)

    batch, c, s = 6, 4, 16          # x.view(B, -1) -> in_channels = 64
    z_dim = 24
    x = jax.random.normal(kx, (batch, c, s), jnp.float32)
    params = make_encoder_params(c * s, kp)

    p_out, mu, sigma = encoder_forward(x, params, z_dim)
    jax.block_until_ready((p_out, mu, sigma))

    p_ref, mu_ref, sig_ref = _reference_forward(x, params, z_dim)
    assert p_out.shape == (batch, _OUT_DIM)
    assert jnp.allclose(p_out, p_ref, atol=1e-4, rtol=1e-4), "params mismatch"
    assert jnp.allclose(mu, mu_ref, atol=1e-4, rtol=1e-4), "mu mismatch"
    assert jnp.allclose(sigma, sig_ref, atol=1e-4, rtol=1e-4), "sigma mismatch"

    print("KERNEL_OK")
</pallas_src>

<mosaic_0001>
module attributes {stable_mosaic.version = 11 : i64} {
  func.func @_encoder_kernel(%arg0: i32, %arg1: memref<8x64xf32, #tpu.memory_space<vmem>>, %arg2: memref<64x128xf32, #tpu.memory_space<vmem>>, %arg3: memref<1x128xf32, #tpu.memory_space<vmem>>, %arg4: memref<128x128xf32, #tpu.memory_space<vmem>>, %arg5: memref<1x128xf32, #tpu.memory_space<vmem>>, %arg6: memref<128x128xf32, #tpu.memory_space<vmem>>, %arg7: memref<1x128xf32, #tpu.memory_space<vmem>>, %arg8: memref<8x128xf32, #tpu.memory_space<vmem>>) attributes {dimension_semantics = [#tpu.dimension_semantics<parallel>], iteration_bounds = array<i64: 1>, scalar_prefetch = 0 : i64, scratch_operands = 0 : i64, tpu.core_type = #tpu.core_type<tc>, window_params = [{transform_indices = @transform_0, window_bounds = array<i64: 8, 64>}, {pipeline_mode = #tpu.pipeline_mode<synchronous>, transform_indices = @transform_1, window_bounds = array<i64: 64, 128>}, {pipeline_mode = #tpu.pipeline_mode<synchronous>, transform_indices = @transform_2, window_bounds = array<i64: 1, 128>}, {pipeline_mode = #tpu.pipeline_mode<synchronous>, transform_indices = @transform_3, window_bounds = array<i64: 128, 128>}, {pipeline_mode = #tpu.pipeline_mode<synchronous>, transform_indices = @transform_4, window_bounds = array<i64: 1, 128>}, {pipeline_mode = #tpu.pipeline_mode<synchronous>, transform_indices = @transform_5, window_bounds = array<i64: 128, 128>}, {pipeline_mode = #tpu.pipeline_mode<synchronous>, transform_indices = @transform_6, window_bounds = array<i64: 1, 128>}, {transform_indices = @transform_7, window_bounds = array<i64: 8, 128>}]} {
    %c0 = arith.constant 0 : index
    %c0_0 = arith.constant 0 : index
    %0 = vector.load %arg1[%c0, %c0_0] : memref<8x64xf32, #tpu.memory_space<vmem>>, vector<8x64xf32>
    %c0_1 = arith.constant 0 : index
    %c0_2 = arith.constant 0 : index
    %1 = vector.load %arg2[%c0_1, %c0_2] : memref<64x128xf32, #tpu.memory_space<vmem>>, vector<64x128xf32>
    %cst = arith.constant dense<0.000000e+00> : vector<8x128xf32>
    %2 = tpu.matmul %0, %1, %cst {dimension_numbers = #tpu.dot_dimension_numbers<[1], [0], [0], [1], [0, 0, 1, 1], [], []>} : vector<8x64xf32>, vector<64x128xf32>, vector<8x128xf32> -> vector<8x128xf32>
    %c0_3 = arith.constant 0 : index
    %c0_4 = arith.constant 0 : index
    %3 = vector.load %arg3[%c0_3, %c0_4] : memref<1x128xf32, #tpu.memory_space<vmem>>, vector<1x128xf32>
    %4 = vector.broadcast %3 : vector<1x128xf32> to vector<8x128xf32>
    %5 = arith.addf %2, %4 : vector<8x128xf32>
    %cst_5 = arith.constant 0.000000e+00 : f32
    %6 = vector.broadcast %cst_5 : f32 to vector<8x128xf32>
    %7 = arith.maximumf %5, %6 : vector<8x128xf32>
    %c0_6 = arith.constant 0 : index
    %c0_7 = arith.constant 0 : index
    %8 = vector.load %arg4[%c0_6, %c0_7] : memref<128x128xf32, #tpu.memory_space<vmem>>, vector<128x128xf32>
    %cst_8 = arith.constant dense<0.000000e+00> : vector<8x128xf32>
    %9 = tpu.matmul %7, %8, %cst_8 {dimension_numbers = #tpu.dot_dimension_numbers<[1], [0], [0], [1], [0, 0, 1, 1], [], []>} : vector<8x128xf32>, vector<128x128xf32>, vector<8x128xf32> -> vector<8x128xf32>
    %c0_9 = arith.constant 0 : index
    %c0_10 = arith.constant 0 : index
    %10 = vector.load %arg5[%c0_9, %c0_10] : memref<1x128xf32, #tpu.memory_space<vmem>>, vector<1x128xf32>
    %11 = vector.broadcast %10 : vector<1x128xf32> to vector<8x128xf32>
    %12 = arith.addf %9, %11 : vector<8x128xf32>
    %cst_11 = arith.constant 0.000000e+00 : f32
    %13 = vector.broadcast %cst_11 : f32 to vector<8x128xf32>
    %14 = arith.maximumf %12, %13 : vector<8x128xf32>
    %c0_12 = arith.constant 0 : index
    %c0_13 = arith.constant 0 : index
    %15 = vector.load %arg6[%c0_12, %c0_13] : memref<128x128xf32, #tpu.memory_space<vmem>>, vector<128x128xf32>
    %cst_14 = arith.constant dense<0.000000e+00> : vector<8x128xf32>
    %16 = tpu.matmul %14, %15, %cst_14 {dimension_numbers = #tpu.dot_dimension_numbers<[1], [0], [0], [1], [0, 0, 1, 1], [], []>} : vector<8x128xf32>, vector<128x128xf32>, vector<8x128xf32> -> vector<8x128xf32>
    %c0_15 = arith.constant 0 : index
    %c0_16 = arith.constant 0 : index
    %17 = vector.load %arg7[%c0_15, %c0_16] : memref<1x128xf32, #tpu.memory_space<vmem>>, vector<1x128xf32>
    %18 = vector.broadcast %17 : vector<1x128xf32> to vector<8x128xf32>
    %19 = arith.addf %16, %18 : vector<8x128xf32>
    %cst_17 = arith.constant 0.000000e+00 : f32
    %20 = vector.broadcast %cst_17 : f32 to vector<8x128xf32>
    %21 = arith.maximumf %19, %20 : vector<8x128xf32>
    %c0_18 = arith.constant 0 : index
    %c0_19 = arith.constant 0 : index
    %22 = vector.load %arg8[%c0_18, %c0_19] : memref<8x128xf32, #tpu.memory_space<vmem>>, vector<8x128xf32>
    tpu.vector_store %arg8[%c0_18, %c0_19], %21 {strides = array<i32>} : memref<8x128xf32, #tpu.memory_space<vmem>>, vector<8x128xf32>,
    return
  }
  func.func @transform_0(%arg0: i32) -> (i32, i32) {
    %c0_i32 = arith.constant 0 : i32
    %c0_i32_0 = arith.constant 0 : i32
    return %arg0, %c0_i32 : i32, i32
  }
  func.func @transform_1(%arg0: i32) -> (i32, i32) {
    %c0_i32 = arith.constant 0 : i32
    %c0_i32_0 = arith.constant 0 : i32
    %c0_i32_1 = arith.constant 0 : i32
    return %c0_i32, %c0_i32_0 : i32, i32
  }
  func.func @transform_2(%arg0: i32) -> (i32, i32) {
    %c0_i32 = arith.constant 0 : i32
    %c0_i32_0 = arith.constant 0 : i32
    %c0_i32_1 = arith.constant 0 : i32
    return %c0_i32, %c0_i32_0 : i32, i32
  }
  func.func @transform_3(%arg0: i32) -> (i32, i32) {
    %c0_i32 = arith.constant 0 : i32
    %c0_i32_0 = arith.constant 0 : i32
    %c0_i32_1 = arith.constant 0 : i32
    return %c0_i32, %c0_i32_0 : i32, i32
  }
  func.func @transform_4(%arg0: i32) -> (i32, i32) {
    %c0_i32 = arith.constant 0 : i32
    %c0_i32_0 = arith.constant 0 : i32
    %c0_i32_1 = arith.constant 0 : i32
    return %c0_i32, %c0_i32_0 : i32, i32
  }
  func.func @transform_5(%arg0: i32) -> (i32, i32) {
    %c0_i32 = arith.constant 0 : i32
    %c0_i32_0 = arith.constant 0 : i32
    %c0_i32_1 = arith.constant 0 : i32
    return %c0_i32, %c0_i32_0 : i32, i32
  }
  func.func @transform_6(%arg0: i32) -> (i32, i32) {
    %c0_i32 = arith.constant 0 : i32
    %c0_i32_0 = arith.constant 0 : i32
    %c0_i32_1 = arith.constant 0 : i32
    return %c0_i32, %c0_i32_0 : i32, i32
  }
  func.func @transform_7(%arg0: i32) -> (i32, i32) {
    %c0_i32 = arith.constant 0 : i32
    %c0_i32_0 = arith.constant 0 : i32
    return %arg0, %c0_i32 : i32, i32
  }
}

</mosaic_0001>

<bundles_post_ra>
// kernel: tpu_custom_call.1
= control target key start
LH: loop header
LB: loop body
LE: loop exit
PB: predicated region body
PF: predicated region fallthrough
CT: control target
= control target key end

     0   :  { %12 = vsyncpa [#allocation3], 0  ;;  %s758_s0 = inlined_call_operand.hbm [shape: f32[6,64], index: 0, kind: input, shape index: {}]   ;;  %s759_s1 = inlined_call_operand.hbm [shape: f32[64,128], index: 1, kind: input, shape index: {}]   ;;  %s760_s2 = inlined_call_operand.vmem [shape: f32[1,128], index: 2, kind: input, shape index: {}]   ;;  %s761_s3 = inlined_call_operand.hbm [shape: f32[128,128], index: 3, kind: input, shape index: {}]   ;;  %s762_s4 = inlined_call_operand.vmem [shape: f32[1,128], index: 4, kind: input, shape index: {}]   ;;  %s763_s5 = inlined_call_operand.hbm [shape: f32[128,128], index: 5, kind: input, shape index: {}]   ;;  %s764_s6 = inlined_call_operand.vmem [shape: f32[1,128], index: 6, kind: input, shape index: {}]   ;;  %s765_s7 = inlined_call_operand.hbm [shape: f32[6,128], index: 7, kind: output, shape index: {}]  }
   0x1   :  { %13 = vsyncpa [#allocation6], 0 }
   0x2   :  { %14 = vsyncpa [#allocation9], 0 }
   0x3   :  { %15 = vsyncpa [#allocation4], 0  ;;  %s630_s24 = smov [#allocation5]  }
   0x4   :  { %s31_s25 = sshll.u32 %s630_s24, 4  ;;  %s32_s25 = int_to_ptr.vmem [resolvable:$true] %s31_s25 }
   0x5   :  { %s530_s26 = scalar_lea.vmem %s32_s25, 1024  ;;  %p535_p1 = scmp.lt.s32.totalorder %s32_s25, %s32_s25 }
   0x6   :  { %p531_p0 = scmp.ne.s32.totalorder %s32_s25, %s530_s26  ;;  %p536_p2 = scmp.lt.s32.totalorder %s530_s26, %s530_s26 }
   0x8   :  { %p537_p3 = por %p536_p2, %p535_p1 }
   0xa   :  { %p538_p4 = pnand %p537_p3, %p531_p0 }
   0xc   :  { %541 = shalt.err (!%p538_p4)
}
   0xd   :  { %s631_s27 = smov 128   ;;  %s632_s28 = smov 8  }
   0xe   :  { %37 = dma.hbm_to_vmem [thread:$0]  %s759_s1, 1024, %s32_s25, [#allocation6], %s631_s27, %s631_s27, %s632_s28  }
   0xf   :  { %s633_s8 = smov [#allocation2]   ;;  %s634_s10 = smov [#allocation7]  }
  0x10   :  { %s22_s9 = sshll.u32 %s633_s8, 4  ;;  %s45_s11 = sshll.u32 %s634_s10, 4  ;;  %s23_s9 = int_to_ptr.vmem [resolvable:$true] %s22_s9  ;;  %s46_s11 = int_to_ptr.vmem [resolvable:$true] %s45_s11 }
  0x11   :  { %s550_s12 = scalar_lea.vmem %s23_s9, 128  ;;  %p555_p6 = scmp.lt.s32.totalorder %s23_s9, %s23_s9 }
  0x12   :  { %p551_p5 = scmp.ne.s32.totalorder %s23_s9, %s550_s12  ;;  %p556_p7 = scmp.lt.s32.totalorder %s550_s12, %s550_s12 }
  0x14   :  { %p557_p8 = por %p556_p7, %p555_p6 }
  0x16   :  { %p558_p9 = pnand %p557_p8, %p551_p5 }
  0x18   :  { %561 = shalt.err (!%p558_p9)
}
  0x19   :  { %25 = dma.hbm_to_vmem [thread:$0]  %s758_s0, 128, %s23_s9, [#allocation3]  }
  0x1a   :  { %s570_s15 = scalar_lea.vmem %s46_s11, 2048  ;;  %p575_p11 = scmp.lt.s32.totalorder %s46_s11, %s46_s11 }
  0x1b   :  { %p571_p10 = scmp.ne.s32.totalorder %s46_s11, %s570_s15  ;;  %p576_p12 = scmp.lt.s32.totalorder %s570_s15, %s570_s15 }
  0x1d   :  { %p577_p13 = por %p576_p12, %p575_p11 }
  0x1f   :  { %p578_p0 = pnand %p577_p13, %p571_p10 }
  0x21   :  { %581 = shalt.err (!%p578_p0)
}
  0x22   :  { %51 = dma.hbm_to_vmem [thread:$0]  %s761_s3, 2048, %s46_s11, [#allocation6], %s631_s27, %s631_s27, %s632_s28  }
  0x23   :  { %s635_s17 = smov [#allocation8]  }
  0x24   :  { %s59_s18 = sshll.u32 %s635_s17, 4  ;;  %s60_s18 = int_to_ptr.vmem [resolvable:$true] %s59_s18 }
  0x25   :  { %s590_s19 = scalar_lea.vmem %s60_s18, 2048  ;;  %p595_p2 = scmp.lt.s32.totalorder %s60_s18, %s60_s18 }
  0x26   :  { %p591_p1 = scmp.ne.s32.totalorder %s60_s18, %s590_s19  ;;  %p596_p3 = scmp.lt.s32.totalorder %s590_s19, %s590_s19 }
  0x28   :  { %p597_p4 = por %p596_p3, %p595_p2 }
  0x2a   :  { %p598_p5 = pnand %p597_p4, %p591_p1 }
  0x2c   :  { %601 = shalt.err (!%p598_p5)
}
  0x2d   :  { %65 = dma.hbm_to_vmem [thread:$0]  %s763_s5, 2048, %s60_s18, [#allocation9], %s631_s27, %s631_s27, %s632_s28  }
  0x2e   :  { %622 = dma.done.wait [#allocation3], 128  }
  0x2f   :  { %623 = vsyncadd [#allocation3], 4294967168 }
  0x30   :  { %624 = dma.done.wait [#allocation6], 3072  }
  0x31   :  { %625 = vsyncadd [#allocation6], 4294964224 }
  0x32   :  { %626 = dma.done.wait [#allocation9], 2048  }
  0x33   :  { %627 = vsyncadd [#allocation9], 4294965248  ;;  %v636_v0 = vmov 0.0   ;;  %vm637_vm0 = vmmov 0   ;;  %v88_v1 = vld [vmem:[#allocation5 + $0x38] sm:$0xff]  ;;  %v87_v2 = vld [vmem:[#allocation5 + $0x30] sm:$0xff] }
  0x34   :  { %424 = vmatprep.subr.mxu0 %v636_v0  ;;  %440 = vmatprep.mubr.msk.f32.mxu0 %vm637_vm0, %v636_v0  ;;  %v86_v3 = vld [vmem:[#allocation5 + $0x28] sm:$0xff]  ;;  %v186_v4 = vld [vmem:[#allocation7 + $0x78] sm:$0xff]  ;;  %v185_v5 = vld [vmem:[#allocation7 + $0x70] sm:$0xff]  ;;  %vm96_vm1 = vcmask 523264   ;;  %s638_s24 = smov [#allocation10]  }
  0x35   :  { %443 = vmatprep.subr.mxu1 %v636_v0  ;;  %475 = vmatprep.mubr.msk.f32.mxu1 %vm637_vm0, %v636_v0  ;;  %v85_v6 = vld [vmem:[#allocation5 + $0x20] sm:$0xff]  ;;  %v184_v7 = vld [vmem:[#allocation7 + $0x68] sm:$0xff]  ;;  %v84_v8 = vld [vmem:[#allocation5 + $0x18] sm:$0xff]  ;;  %s366_s25 = sshll.u32 %s638_s24, 4  ;;  %s367_s25 = int_to_ptr.vmem [resolvable:$true] %s366_s25 }
  0x36   :  { %425 = vmatpush3.msra.mxu0 %v88_v1  ;;  %444 = vmatpush3.msra.mxu1 %v186_v4  ;;  %v183_v9 = vld [vmem:[#allocation7 + $0x60] sm:$0xff]  ;;  %v83_v10 = vld [vmem:[#allocation5 + $0x10] sm:$0xff]  ;;  %v182_v11 = vld [vmem:[#allocation7 + $0x58] sm:$0xff]  ;;  %s602_s26 = scalar_lea.vmem %s367_s25, 128  ;;  %p607_p7 = scmp.lt.s32.totalorder %s367_s25, %s367_s25 }
  0x37   :  { %426 = vmatprep.subr.mxu0 %v636_v0  ;;  %445 = vmatprep.subr.mxu1 %v636_v0  ;;  %v82_v12 = vld [vmem:[#allocation5 + $0x8] sm:$0xff]  ;;  %v181_v13 = vld [vmem:[#allocation7 + $0x50] sm:$0xff]  ;;  %v81_v14 = vld [vmem:[#allocation5] sm:$0xff]  ;;  %p603_p6 = scmp.ne.s32.totalorder %s367_s25, %s602_s26  ;;  %p608_p8 = scmp.lt.s32.totalorder %s602_s26, %s602_s26 }
  0x38   :  { %427 = vmatpush3.msra.mxu0 %v87_v2  ;;  %446 = vmatpush3.msra.mxu1 %v185_v5  ;;  %v80_v15 = vld [vmem:[#allocation2] sm:$0xff]  ;;  %v180_v16 = vld [vmem:[#allocation7 + $0x48] sm:$0xff]  ;;  %v179_v17 = vld [vmem:[#allocation7 + $0x40] sm:$0xff] }
  0x39   :  { %428 = vmatprep.subr.mxu0 %v636_v0  ;;  %447 = vmatprep.subr.mxu1 %v636_v0  ;;  %v178_v18 = vld [vmem:[#allocation7 + $0x38] sm:$0xff]  ;;  %v177_v19 = vld [vmem:[#allocation7 + $0x30] sm:$0xff]  ;;  %v176_v20 = vld [vmem:[#allocation7 + $0x28] sm:$0xff]  ;;  %p609_p9 = por %p608_p8, %p607_p7 }
  0x3a   :  { %429 = vmatpush3.msra.mxu0 %v86_v3  ;;  %448 = vmatpush3.msra.mxu1 %v184_v7  ;;  %v175_v21 = vld [vmem:[#allocation7 + $0x20] sm:$0xff]  ;;  %v174_v22 = vld [vmem:[#allocation7 + $0x18] sm:$0xff]  ;;  %v173_v23 = vld [vmem:[#allocation7 + $0x10] sm:$0xff] }
  0x3b   :  { %430 = vmatprep.subr.mxu0 %v636_v0  ;;  %449 = vmatprep.subr.mxu1 %v636_v0  ;;  %v172_v24 = vld [vmem:[#allocation7 + $0x8] sm:$0xff]  ;;  %v171_v25 = vld [vmem:[#allocation7] sm:$0xff]  ;;  %v280_v26 = vld [vmem:[#allocation8 + $0x78] sm:$0xff]  ;;  %p610_p10 = pnand %p609_p9, %p603_p6 }
  0x3c   :  { %431 = vmatpush3.msra.mxu0 %v85_v6  ;;  %450 = vmatpush3.msra.mxu1 %v183_v9  ;;  %v279_v27 = vld [vmem:[#allocation8 + $0x70] sm:$0xff]  ;;  %v278_v28 = vld [vmem:[#allocation8 + $0x68] sm:$0xff]  ;;  %v277_v29 = vld [vmem:[#allocation8 + $0x60] sm:$0xff] }
  0x3d   :  { %432 = vmatprep.subr.mxu0 %v636_v0  ;;  %451 = vmatprep.subr.mxu1 %v636_v0  ;;  %v276_v30 = vld [vmem:[#allocation8 + $0x58] sm:$0xff]  ;;  %v275_v31 = vld [vmem:[#allocation8 + $0x50] sm:$0xff]  ;;  %v274_v32 = vld [vmem:[#allocation8 + $0x48] sm:$0xff] }
  0x3e   :  { %433 = vmatpush3.msra.mxu0 %v84_v8  ;;  %452 = vmatpush3.msra.mxu1 %v182_v11  ;;  %v273_v33 = vld [vmem:[#allocation8 + $0x40] sm:$0xff]  ;;  %v272_v34 = vld [vmem:[#allocation8 + $0x38] sm:$0xff]  ;;  %v271_v35 = vld [vmem:[#allocation8 + $0x30] sm:$0xff] }
  0x3f   :  { %434 = vmatprep.subr.mxu0 %v636_v0  ;;  %453 = vmatprep.subr.mxu1 %v636_v0  ;;  %v270_v36 = vld [vmem:[#allocation8 + $0x28] sm:$0xff]  ;;  %v269_v37 = vld [vmem:[#allocation8 + $0x20] sm:$0xff]  ;;  %v268_v38 = vld [vmem:[#allocation8 + $0x18] sm:$0xff] }
  0x40   :  { %435 = vmatpush3.msra.mxu0 %v83_v10  ;;  %454 = vmatpush3.msra.mxu1 %v181_v13  ;;  %v377_v39 = vld [vmem:[%s760_s2] ss:$0 sm:$0xff]  ;;  %v267_v44 = vld [vmem:[#allocation8 + $0x10] sm:$0xff]  ;;  %v266_v45 = vld [vmem:[#allocation8 + $0x8] sm:$0xff] }
  0x41   :  { %436 = vmatprep.subr.mxu0 %v636_v0  ;;  %455 = vmatprep.subr.mxu1 %v636_v0  ;;  %v265_v46 = vld [vmem:[#allocation8] sm:$0xff]  ;;  %v379_v47 = vld [vmem:[%s762_s4] ss:$0 sm:$0xff] }
  0x42   :  { %437 = vmatpush3.msra.mxu0 %v82_v12  ;;  %456 = vmatpush3.msra.mxu1 %v180_v16  ;;  %v380_v52 = vld [vmem:[%s764_s6] ss:$0 sm:$0xff] }
  0x43   :  { %438 = vmatprep.subr.mxu0 %v636_v0  ;;  %457 = vmatprep.subr.mxu1 %v636_v0 }
  0x44   :  { %439 = vmatpush3.msra.mxu0 %v81_v14  ;;  %458 = vmatpush3.msra.mxu1 %v179_v17 }
  0x45   :  { %441 = vmatmul.mubr.msk.f32.vlgmr.msra.gmra.mxu0 %vm96_vm1, %v80_v15  ;;  %478 = vmatprep.subr.mxu0 %v636_v0 }
  0x46   :  { %510 = vmatprep.mubr.msk.f32.mxu0 %vm637_vm0, %v636_v0  ;;  %459 = vmatprep.subr.mxu1 %v636_v0 }
  0x47   :  { %460 = vmatpush3.msra.mxu1 %v178_v18  ;;  %479 = vmatpush3.msra.mxu0 %v280_v26 }
  0x48   :  { %461 = vmatprep.subr.mxu1 %v636_v0  ;;  %480 = vmatprep.subr.mxu0 %v636_v0 }
  0x49   :  { %462 = vmatpush3.msra.mxu1 %v177_v19  ;;  %481 = vmatpush3.msra.mxu0 %v279_v27 }
  0x4a   :  { %463 = vmatprep.subr.mxu1 %v636_v0  ;;  %482 = vmatprep.subr.mxu0 %v636_v0 }
  0x4b   :  { %464 = vmatpush3.msra.mxu1 %v176_v20  ;;  %483 = vmatpush3.msra.mxu0 %v278_v28 }
  0x4c   :  { %465 = vmatprep.subr.mxu1 %v636_v0  ;;  %484 = vmatprep.subr.mxu0 %v636_v0 }
  0x4d   :  { %466 = vmatpush3.msra.mxu1 %v175_v21  ;;  %485 = vmatpush3.msra.mxu0 %v277_v29 }
  0x4e   :  { %467 = vmatprep.subr.mxu1 %v636_v0  ;;  %486 = vmatprep.subr.mxu0 %v636_v0 }
  0x4f   :  { %468 = vmatpush3.msra.mxu1 %v174_v22  ;;  %487 = vmatpush3.msra.mxu0 %v276_v30 }
  0x50   :  { %469 = vmatprep.subr.mxu1 %v636_v0  ;;  %488 = vmatprep.subr.mxu0 %v636_v0 }
  0x51   :  { %470 = vmatpush3.msra.mxu1 %v173_v23  ;;  %489 = vmatpush3.msra.mxu0 %v275_v31 }
  0x52   :  { %471 = vmatprep.subr.mxu1 %v636_v0  ;;  %490 = vmatprep.subr.mxu0 %v636_v0 }
  0x53   :  { %472 = vmatpush3.msra.mxu1 %v172_v24  ;;  %491 = vmatpush3.msra.mxu0 %v274_v32 }
  0x54   :  { %473 = vmatprep.subr.mxu1 %v636_v0  ;;  %492 = vmatprep.subr.mxu0 %v636_v0 }
  0x55   :  { %474 = vmatpush3.msra.mxu1 %v171_v25  ;;  %493 = vmatpush3.msra.mxu0 %v273_v33 }
  0x56   :  { %494 = vmatprep.subr.mxu0 %v636_v0 }
  0x57   :  { %495 = vmatpush3.msra.mxu0 %v272_v34 }
  0x58   :  { %496 = vmatprep.subr.mxu0 %v636_v0 }
  0x59   :  { %497 = vmatpush3.msra.mxu0 %v271_v35 }
  0x5a   :  { %498 = vmatprep.subr.mxu0 %v636_v0 }
  0x5b   :  { %499 = vmatpush3.msra.mxu0 %v270_v36 }
  0x5c   :  { %500 = vmatprep.subr.mxu0 %v636_v0 }
  0x5d   :  { %501 = vmatpush3.msra.mxu0 %v269_v37 }
  0x5e   :  { %502 = vmatprep.subr.mxu0 %v636_v0 }
  0x5f   :  { %503 = vmatpush3.msra.mxu0 %v268_v38 }
  0x60   :  { %504 = vmatprep.subr.mxu0 %v636_v0 }
  0x61   :  { %505 = vmatpush3.msra.mxu0 %v267_v44 }
  0x62   :  { %506 = vmatprep.subr.mxu0 %v636_v0 }
  0x63   :  { %507 = vmatpush3.msra.mxu0 %v266_v45 }
  0x64   :  { %508 = vmatprep.subr.mxu0 %v636_v0 }
  0x65   :  { %509 = vmatpush3.msra.mxu0 %v265_v46 }
 0x105   :  { %v166_v40 = vpop.f32.mrf.mxu0 }
 0x106   :  { %v167_v41 = vadd.f32 %v377_v39, %v166_v40 }
 0x107   :  { %v442_v42 = vpop.f32.mrf.mxu0 }
 0x108   :  { %v170_v43 = vmax.f32 %v167_v41, 0.0 }
 0x10a   :  { %476 = vmatmul.mubr.f32.vlgmr.msra.gmra.mxu1 %v170_v43 }
 0x1ca   :  { %v260_v48 = vpop.f32.mrf.mxu1 }
 0x1cb   :  { %v261_v49 = vadd.f32 %v379_v47, %v260_v48 }
 0x1cc   :  { %v477_v50 = vpop.f32.mrf.mxu1 }
 0x1cd   :  { %v264_v51 = vmax.f32 %v261_v49, 0.0 }
 0x1cf   :  { %511 = vmatmul.mubr.f32.vlgmr.msra.gmra.mxu0 %v264_v51 }
 0x28f   :  { %v354_v53 = vpop.f32.mrf.mxu0 }
 0x290   :  { %v355_v54 = vadd.f32 %v380_v52, %v354_v53 }
 0x291   :  { %v512_v55 = vpop.f32.mrf.mxu0 }
 0x292   :  { %v358_v56 = vmax.f32 %v355_v54, 0.0 }
 0x294   :  { %359 = vst [vmem:[#allocation10] sm:$0xff] %v358_v56 }
 0x295   :  { %613 = shalt.err (!%p610_p10)
}
 0x296   :  { %369 = dma.vmem_to_hbm [thread:$0]  %s367_s25, 128, %s765_s7, [#allocation4]  }
 0x297   :  { %628 = dma.done.wait [#allocation4], 128  }
 0x298   :  { %629 = vsyncadd [#allocation4], 4294967168 }
 0x299   :  { %373 = vsyncpa [#allocation3], 1 }
 0x29a   :  { %374 = vsyncpa [#allocation6], 1 }
 0x29b   :  { %375 = vsyncpa [#allocation9], 1 }
 0x29c   :  { %376 = vsyncpa [#allocation4], 1 }

</bundles_post_ra>
